<compile_context>
chip_gen: v5e
topology: v5e:2x2
jax: 0.10.0
libtpu: 0.0.40
codegen_flags: <defaults>
</compile_context>

<pallas_src>
import functools
import math

import jax
import jax.numpy as jnp
from jax import lax
from jax.experimental import pallas as pl
from jax.experimental.pallas import tpu as pltpu


# ------------------------- tiling configuration ---------------------------- #
_MAX_CHANNEL_TILE = 256       # sublane tile cap for the streaming (two-phase) path
_MAX_LANE_TILE = 8192         # lane tile cap (multiple of 128)


def _round_up(x, m):
    return ((x + m - 1) // m) * m


@functools.lru_cache(maxsize=1)
def _budgets():
    """(per-block byte budget, single-pass slab budget, vmem_limit_bytes) per generation."""
    try:
        vmem = int(pltpu.get_tpu_info().vmem_capacity_bytes)
    except Exception:                       # conservative (v7x-sized) fallback
        vmem = 64 * 1024 * 1024
    if vmem >= 100 * 1024 * 1024:           # v5e / v6e / v5p: 128 MiB VMEM
        return 8 * 2**20, 12 * 2**20, 64 * 2**20
    return 4 * 2**20, 6 * 2**20, 32 * 2**20  # v7x: 64 MiB physical / 32 MiB scoped


def _sublane_packing(dtype):
    # rows packed per 32-bit sublane: f32 -> 8, bf16 -> 16, int8/fp8 -> 32
    return max(8, 32 // jnp.dtype(dtype).itemsize)


def _pick_channel_tile(c, packing, max_tc):
    """Channel (sublane) tile: multiple of the dtype packing (or full C), capped
    so the channel ('parallel') grid axis gets >= 2 tiles when possible (v7x)."""
    max_tc = max(packing, max_tc)
    if c >= 2 * packing:
        max_tc = min(max_tc, max(packing, (c // 2) // packing * packing))
    if c <= max_tc:
        return c                           # block dim == full array dim is legal
    best = packing
    t = packing
    while t <= max_tc:
        if c % t == 0:
            best = t
        t += packing
    return best                            # ragged last tile handled via cdiv grid


def _pick_lane_tile(b, tc, elem, block_budget):
    """Lane tile: multiple of 128 within the per-block byte budget."""
    max_tb = (block_budget // max(1, tc * elem)) // 128 * 128
    max_tb = max(128, min(_MAX_LANE_TILE, max_tb))
    return min(max_tb, _round_up(b, 128))


def _to_3d(x, channel_axis):
    """Contiguous (A, C, B) view of x with C = quantization channel axis (free reshape)."""
    if channel_axis < 0:
        return x.reshape(1, 1, -1)
    shape = x.shape
    a = math.prod(shape[:channel_axis]) if channel_axis > 0 else 1
    c = shape[channel_axis]
    b = math.prod(shape[channel_axis + 1:]) if channel_axis + 1 < len(shape) else 1
    return x.reshape(a, c, b)


def _use_channel_last(x, channel_axis):
    """Lane-major fast path: channel axis is the trailing dim and a full-column
    block fits the per-generation block budget."""
    if channel_axis < 0 or channel_axis != x.ndim - 1:
        return False
    block_budget, _, _ = _budgets()
    rows = math.prod(x.shape[:-1]) if x.ndim > 1 else 1
    c = x.shape[-1]
    # TODO(synk): very tall channel-last tensors (rows*128*itemsize > budget) fall
    # back to the (slower but correct) generic path instead of a sublane-tiled one.
    return rows * min(c, 128) * x.dtype.itemsize <= block_budget


# ----------------------------- Pallas kernels ------------------------------ #

def _fused_small_kernel(x_ref, y_ref, scale_ref, *, qmin, qmax):
    """Single pass: block = (A, tc, B) slab. abs-max -> scale -> quantize, x read once."""
    x = x_ref[...]                                        # (a, tc, b) native dtype
    m = jnp.max(jnp.abs(x), axis=2, keepdims=True)        # (a, tc, 1) native
    m = jnp.max(m, axis=0).astype(jnp.float32)            # (tc, 1)
    scale = jnp.where(m > 0.0, m / qmax, jnp.ones_like(m))
    scale_ref[...] = scale
    inv = 1.0 / scale                                      # per-channel reciprocal (tiny)
    xf = x.astype(jnp.float32)
    q = jnp.clip(jnp.round(xf * inv[None]), qmin, qmax)
    y_ref[...] = (q * scale[None]).astype(y_ref.dtype)


def _fused_train_kernel(x_ref, y_ref, scale_ref, inv_ref, *, qmin, qmax,
                        b_valid, tb, masked):
    """Two-phase streaming path for large tensors.
    Phase 0: per-channel abs-max -> scale (resident (tc,1) output block) + 1/scale scratch.
    Phase 1: fake-quantize.  One pallas_call; scale never round-trips HBM."""
    phase = pl.program_id(1)
    n = pl.program_id(2)
    bi = pl.program_id(3)
    n_last = pl.num_programs(2) - 1
    b_last = pl.num_programs(3) - 1

    @pl.when(phase == 0)
    def _reduce_phase():
        @pl.when((n == 0) & (bi == 0))
        def _init():
            scale_ref[...] = jnp.zeros_like(scale_ref)
            # Insurance: the y block (0, ci, 0) stays resident-but-unwritten through
            # phase 0 (constant out index); zero it so even a pathological early
            # writeback stores defined data (phase 1 rewrites it before the end).
            y_ref[...] = jnp.zeros_like(y_ref)

        ax = jnp.abs(x_ref[0])                             # (tc, tb) native dtype
        if masked:
            lane = lax.broadcasted_iota(jnp.int32, ax.shape, 1) + bi * tb
            ax = jnp.where(lane < b_valid, ax, jnp.zeros_like(ax))
        tile_max = jnp.max(ax, axis=-1, keepdims=True).astype(jnp.float32)
        m = jnp.maximum(scale_ref[...], tile_max)
        scale_ref[...] = m

        @pl.when((n == n_last) & (bi == b_last))
        def _finalize():
            s = jnp.where(m > 0.0, m / qmax, jnp.ones_like(m))
            scale_ref[...] = s
            inv_ref[...] = 1.0 / s                          # hoisted per-channel reciprocal

    @pl.when(phase == 1)
    def _quant_phase():
        scale = scale_ref[...]                              # (tc, 1) f32, VMEM-resident
        inv = inv_ref[...]
        xf = x_ref[0].astype(jnp.float32)                   # (tc, tb)
        q = jnp.clip(jnp.round(xf * inv), qmin, qmax)
        y_ref[0] = (q * scale).astype(y_ref.dtype)


def _scale_kernel(x_ref, scale_ref, *, qmax, b_valid, tb, masked):
    """Standalone per-channel abs-max reduction with fused scale finalization."""
    n = pl.program_id(1)
    bi = pl.program_id(2)

    @pl.when((n == 0) & (bi == 0))
    def _init():
        scale_ref[...] = jnp.zeros_like(scale_ref)

    ax = jnp.abs(x_ref[0])
    if masked:
        lane = lax.broadcasted_iota(jnp.int32, ax.shape, 1) + bi * tb
        ax = jnp.where(lane < b_valid, ax, jnp.zeros_like(ax))
    tile_max = jnp.max(ax, axis=-1, keepdims=True).astype(jnp.float32)
    m = jnp.maximum(scale_ref[...], tile_max)
    scale_ref[...] = m

    @pl.when((n == pl.num_programs(1) - 1) & (bi == pl.num_programs(2) - 1))
    def _finalize():
        scale_ref[...] = jnp.where(m > 0.0, m / qmax, jnp.ones_like(m))


def _quantize_kernel(x_ref, scale_ref, y_ref, *, qmin, qmax):
    """out = clip(round(x * (1/scale)), qmin, qmax) * scale (per-channel scale)."""
    scale = scale_ref[...]                                  # (tc, 1) f32
    inv = 1.0 / scale                                       # tc values only
    xf = x_ref[0].astype(jnp.float32)                       # (tc, tb)
    q = jnp.clip(jnp.round(xf * inv), qmin, qmax)
    y_ref[0] = (q * scale).astype(y_ref.dtype)


# ---- channel-axis-last (lane-major) kernels: x viewed as (rows, C) -------- #

def _fused_last_kernel(x_ref, y_ref, scale_ref, *, qmin, qmax):
    x = x_ref[...]                                          # (rows, tcl) native
    m = jnp.max(jnp.abs(x), axis=0, keepdims=True).astype(jnp.float32)   # (1, tcl)
    scale = jnp.where(m > 0.0, m / qmax, jnp.ones_like(m))
    scale_ref[...] = scale                                  # lane-dense store
    inv = 1.0 / scale
    xf = x.astype(jnp.float32)
    q = jnp.clip(jnp.round(xf * inv), qmin, qmax)
    y_ref[...] = (q * scale).astype(y_ref.dtype)


def _scale_last_kernel(x_ref, scale_ref, *, qmax):
    m = jnp.max(jnp.abs(x_ref[...]), axis=0, keepdims=True).astype(jnp.float32)
    scale_ref[...] = jnp.where(m > 0.0, m / qmax, jnp.ones_like(m))


def _quantize_last_kernel(x_ref, scale_ref, y_ref, *, qmin, qmax):
    scale = scale_ref[...]                                  # (1, tcl) f32
    inv = 1.0 / scale
    xf = x_ref[...].astype(jnp.float32)
    q = jnp.clip(jnp.round(xf * inv), qmin, qmax)
    y_ref[...] = (q * scale).astype(y_ref.dtype)


# ------------------------------ wrappers ----------------------------------- #

def _qbounds(bits):
    return float(-(2 ** (bits - 1))), float(2 ** (bits - 1) - 1)


def _train_quantize_general(x, bits, channel_axis, force_two_phase=False):
    orig_shape = x.shape
    x3 = _to_3d(x, channel_axis)
    a, c, b = x3.shape
    elem = x3.dtype.itemsize
    packing = _sublane_packing(x3.dtype)
    block_budget, slab_budget, vmem_limit = _budgets()
    qmin, qmax = _qbounds(bits)
    nbytes = a * c * b * elem

    small = (not force_two_phase) and (a * b * elem * min(c, packing) <= slab_budget)

    if small:
        # -------- single-pass fused kernel: x read once (2N HBM traffic) -------
        max_tc = max(1, slab_budget // max(1, a * b * elem))
        tc = _pick_channel_tile(c, packing, max_tc)
        n_ct = pl.cdiv(c, tc)
        y3, scale = pl.pallas_call(
            functools.partial(_fused_small_kernel, qmin=qmin, qmax=qmax),
            out_shape=(jax.ShapeDtypeStruct((a, c, b), x3.dtype),
                       jax.ShapeDtypeStruct((c, 1), jnp.float32)),
            grid_spec=pltpu.PrefetchScalarGridSpec(
                num_scalar_prefetch=0,
                grid=(n_ct,),
                in_specs=[pl.BlockSpec((a, tc, b), lambda ci: (0, ci, 0))],
                out_specs=(pl.BlockSpec((a, tc, b), lambda ci: (0, ci, 0)),
                           pl.BlockSpec((tc, 1), lambda ci: (ci, 0)))),
            compiler_params=pltpu.CompilerParams(
                dimension_semantics=("parallel",),
                vmem_limit_bytes=vmem_limit),
            cost_estimate=pl.CostEstimate(
                flops=7 * a * c * b, transcendentals=0,
                bytes_accessed=2 * nbytes + 4 * c),
        )(x3)
        return y3.reshape(orig_shape), scale

    # ------------- two-phase streaming kernel (large tensors) ------------------
    tc = _pick_channel_tile(c, packing, _MAX_CHANNEL_TILE)
    tb = _pick_lane_tile(b, tc, elem, block_budget)
    n_ct, n_bt = pl.cdiv(c, tc), pl.cdiv(b, tb)
    masked = (b % tb) != 0

    y3, scale = pl.pallas_call(
        functools.partial(_fused_train_kernel, qmin=qmin, qmax=qmax,
                          b_valid=b, tb=tb, masked=masked),
        out_shape=(jax.ShapeDtypeStruct((a, c, b), x3.dtype),
                   jax.ShapeDtypeStruct((c, 1), jnp.float32)),
        grid_spec=pltpu.PrefetchScalarGridSpec(
            num_scalar_prefetch=0,
            grid=(n_ct, 2, a, n_bt),                # (channel, phase, A, B-tiles)
            in_specs=[pl.BlockSpec((1, tc, tb), lambda ci, p, n, bi: (n, ci, bi))],
            out_specs=(
                # phase 0: constant index -> y block stays resident (no writeback of
                # untouched blocks); phase 1 streams the quantized tiles normally.
                pl.BlockSpec((1, tc, tb), lambda ci, p, n, bi: (n * p, ci, bi * p)),
                pl.BlockSpec((tc, 1), lambda ci, p, n, bi: (ci, 0))),
            scratch_shapes=[pltpu.VMEM((tc, 1), jnp.float32)]),   # per-channel 1/scale
        compiler_params=pltpu.CompilerParams(
            dimension_semantics=("parallel", "arbitrary", "arbitrary", "arbitrary"),
            vmem_limit_bytes=vmem_limit),
        cost_estimate=pl.CostEstimate(
            flops=7 * a * c * b, transcendentals=0,
            bytes_accessed=3 * nbytes + 4 * c),
    )(x3)
    return y3.reshape(orig_shape), scale


def _channel_scale_general(x, bits, channel_axis):
    x3 = _to_3d(x, channel_axis)
    a, c, b = x3.shape
    elem = x3.dtype.itemsize
    packing = _sublane_packing(x3.dtype)
    block_budget, _, vmem_limit = _budgets()
    _, qmax = _qbounds(bits)
    tc = _pick_channel_tile(c, packing, _MAX_CHANNEL_TILE)
    tb = _pick_lane_tile(b, tc, elem, block_budget)
    n_ct, n_bt = pl.cdiv(c, tc), pl.cdiv(b, tb)
    masked = (b % tb) != 0

    return pl.pallas_call(
        functools.partial(_scale_kernel, qmax=qmax, b_valid=b, tb=tb, masked=masked),
        out_shape=jax.ShapeDtypeStruct((c, 1), jnp.float32),
        grid_spec=pltpu.PrefetchScalarGridSpec(
            num_scalar_prefetch=0,
            grid=(n_ct, a, n_bt),
            in_specs=[pl.BlockSpec((1, tc, tb), lambda ci, n, bi: (n, ci, bi))],
            out_specs=pl.BlockSpec((tc, 1), lambda ci, n, bi: (ci, 0))),
        compiler_params=pltpu.CompilerParams(
            dimension_semantics=("parallel", "arbitrary", "arbitrary"),
            vmem_limit_bytes=vmem_limit),
        cost_estimate=pl.CostEstimate(
            flops=2 * a * c * b, transcendentals=0,
            bytes_accessed=a * c * b * elem + 4 * c),
    )(x3)


def _apply_quantize_general(x, scale, bits, channel_axis):
    orig_shape = x.shape
    x3 = _to_3d(x, channel_axis)
    a, c, b = x3.shape
    elem = x3.dtype.itemsize
    packing = _sublane_packing(x3.dtype)
    block_budget, _, vmem_limit = _budgets()
    qmin, qmax = _qbounds(bits)
    tc = _pick_channel_tile(c, packing, _MAX_CHANNEL_TILE)
    tb = _pick_lane_tile(b, tc, elem, block_budget)
    n_ct, n_bt = pl.cdiv(c, tc), pl.cdiv(b, tb)
    scale2 = jnp.asarray(scale, dtype=jnp.float32).reshape(c, -1)[:, :1]
    nbytes = a * c * b * elem

    y3 = pl.pallas_call(
        functools.partial(_quantize_kernel, qmin=qmin, qmax=qmax),
        out_shape=jax.ShapeDtypeStruct((a, c, b), x3.dtype),
        grid_spec=pltpu.PrefetchScalarGridSpec(
            num_scalar_prefetch=0,
            grid=(n_ct, a, n_bt),
            in_specs=[pl.BlockSpec((1, tc, tb), lambda ci, n, bi: (n, ci, bi)),
                      pl.BlockSpec((tc, 1), lambda ci, n, bi: (ci, 0))],
            out_specs=pl.BlockSpec((1, tc, tb), lambda ci, n, bi: (n, ci, bi))),
        compiler_params=pltpu.CompilerParams(
            dimension_semantics=("parallel", "parallel", "arbitrary"),
            vmem_limit_bytes=vmem_limit),
        cost_estimate=pl.CostEstimate(
            flops=5 * a * c * b, transcendentals=0,
            bytes_accessed=2 * nbytes + 4 * c),
    )(x3, scale2)
    return y3.reshape(orig_shape)


# ---- channel-axis-last wrappers -------------------------------------------- #

def _last_layout(x):
    c = x.shape[-1]
    rows = math.prod(x.shape[:-1]) if x.ndim > 1 else 1
    return x.reshape(rows, c), rows, c


def _pick_channel_lanes(c, rows, elem, block_budget):
    max_lanes = block_budget // max(1, rows * elem)
    if c <= max_lanes:
        return c
    return max(128, min(_MAX_LANE_TILE, max_lanes // 128 * 128))


def _train_quantize_last(x, bits):
    orig_shape = x.shape
    x2, rows, c = _last_layout(x)
    elem = x2.dtype.itemsize
    block_budget, _, vmem_limit = _budgets()
    qmin, qmax = _qbounds(bits)
    tcl = _pick_channel_lanes(c, rows, elem, block_budget)
    nbytes = rows * c * elem

    y2, scale = pl.pallas_call(
        functools.partial(_fused_last_kernel, qmin=qmin, qmax=qmax),
        out_shape=(jax.ShapeDtypeStruct((rows, c), x2.dtype),
                   jax.ShapeDtypeStruct((1, c), jnp.float32)),
        grid_spec=pltpu.PrefetchScalarGridSpec(
            num_scalar_prefetch=0,
            grid=(pl.cdiv(c, tcl),),
            in_specs=[pl.BlockSpec((rows, tcl), lambda ci: (0, ci))],
            out_specs=(pl.BlockSpec((rows, tcl), lambda ci: (0, ci)),
                       pl.BlockSpec((1, tcl), lambda ci: (0, ci)))),
        compiler_params=pltpu.CompilerParams(
            dimension_semantics=("parallel",), vmem_limit_bytes=vmem_limit),
        cost_estimate=pl.CostEstimate(
            flops=7 * rows * c, transcendentals=0,
            bytes_accessed=2 * nbytes + 4 * c),
    )(x2)
    return y2.reshape(orig_shape), scale.reshape(c, 1)


def _channel_scale_last(x, bits):
    x2, rows, c = _last_layout(x)
    elem = x2.dtype.itemsize
    block_budget, _, vmem_limit = _budgets()
    _, qmax = _qbounds(bits)
    tcl = _pick_channel_lanes(c, rows, elem, block_budget)

    scale = pl.pallas_call(
        functools.partial(_scale_last_kernel, qmax=qmax),
        out_shape=jax.ShapeDtypeStruct((1, c), jnp.float32),
        grid_spec=pltpu.PrefetchScalarGridSpec(
            num_scalar_prefetch=0,
            grid=(pl.cdiv(c, tcl),),
            in_specs=[pl.BlockSpec((rows, tcl), lambda ci: (0, ci))],
            out_specs=pl.BlockSpec((1, tcl), lambda ci: (0, ci))),
        compiler_params=pltpu.CompilerParams(
            dimension_semantics=("parallel",), vmem_limit_bytes=vmem_limit),
        cost_estimate=pl.CostEstimate(
            flops=2 * rows * c, transcendentals=0,
            bytes_accessed=rows * c * elem + 4 * c),
    )(x2)
    return scale.reshape(c, 1)


def _apply_quantize_last(x, scale, bits):
    orig_shape = x.shape
    x2, rows, c = _last_layout(x)
    elem = x2.dtype.itemsize
    block_budget, _, vmem_limit = _budgets()
    qmin, qmax = _qbounds(bits)
    tcl = _pick_channel_lanes(c, rows, elem, block_budget)
    scale_row = jnp.asarray(scale, dtype=jnp.float32).reshape(c, -1)[:, 0].reshape(1, c)

    y2 = pl.pallas_call(
        functools.partial(_quantize_last_kernel, qmin=qmin, qmax=qmax),
        out_shape=jax.ShapeDtypeStruct((rows, c), x2.dtype),
        grid_spec=pltpu.PrefetchScalarGridSpec(
            num_scalar_prefetch=0,
            grid=(pl.cdiv(c, tcl),),
            in_specs=[pl.BlockSpec((rows, tcl), lambda ci: (0, ci)),
                      pl.BlockSpec((1, tcl), lambda ci: (0, ci))],
            out_specs=pl.BlockSpec((rows, tcl), lambda ci: (0, ci))),
        compiler_params=pltpu.CompilerParams(
            dimension_semantics=("parallel",), vmem_limit_bytes=vmem_limit),
        cost_estimate=pl.CostEstimate(
            flops=5 * rows * c, transcendentals=0,
            bytes_accessed=2 * rows * c * elem + 4 * c),
    )(x2, scale_row)
    return y2.reshape(orig_shape)


# ------------------------------ dispatchers --------------------------------- #

def _train_quantize(x, bits, channel_axis, force_two_phase=False):
    if not force_two_phase and _use_channel_last(x, channel_axis):
        return _train_quantize_last(x, bits)
    return _train_quantize_general(x, bits, channel_axis, force_two_phase)


def _channel_scale(x, bits, channel_axis):
    if _use_channel_last(x, channel_axis):
        return _channel_scale_last(x, bits)
    return _channel_scale_general(x, bits, channel_axis)


def _apply_quantize(x, scale, bits, channel_axis):
    if _use_channel_last(x, channel_axis):
        return _apply_quantize_last(x, scale, bits)
    return _apply_quantize_general(x, scale, bits, channel_axis)


# ---------------------- callback (BaseQuantizer analogue) ------------------- #

class ScalerQuantizer:
    """Per-channel, scale-only linear fake quantizer (weight_size = 1).

    # TODO(synk): the concrete qsparse callback (e.g. DecimalQuantizer line
    # search) is not part of the provided module; a deterministic abs-max
    # scaler is used for `optimize`.
    """
    weight_size = 1

    def optimize(self, tensor, bits, weight=None, batched=False,
                 channel_index=-1, **_):
        return _channel_scale(tensor, bits, channel_index)

    def __call__(self, tensor, bits, weight, channel_index=-1, **_):
        return _apply_quantize(tensor, weight, bits, channel_index)

    # fused fast path used by QuantizeLayer during training
    def optimize_and_call(self, tensor, bits, weight=None, channel_index=-1, **_):
        return _train_quantize(tensor, bits, channel_index)


# ------------------------------ QuantizeLayer ------------------------------- #

class QuantizeLayer:
    def __init__(self, bits=8, channelwise=1, timeout=1000, callback=None,
                 batch_dimension=0, name=""):
        self.name = name
        self.channelwise = channelwise
        self.timeout = timeout
        self.bits = bits
        self.callback = callback if callback is not None else ScalerQuantizer()
        self.batch_dimension = batch_dimension
        self._quantized = False
        self.training = True

    @property
    def initted(self):
        return hasattr(self, "_n_updates")

    def forward(self, x):
        if not self.initted:
            c = 1 if self.channelwise < 0 else x.shape[self.channelwise]
            self.weight = jnp.zeros((c, self.callback.weight_size), jnp.float32)
            self._n_updates = 0                   # host-side step counter (buffer)

        t = self._n_updates
        out = x
        if self.timeout > 0:
            if t >= self.timeout:
                if self.training:
                    if hasattr(self.callback, "optimize_and_call"):
                        # fused abs-max -> scale -> fake-quant (single pallas_call)
                        out, new_weight = self.callback.optimize_and_call(
                            x, self.bits, self.weight,
                            channel_index=self.channelwise)
                    else:
                        new_weight = self.callback.optimize(
                            x, self.bits, self.weight,
                            batched=self.batch_dimension == 0,
                            channel_index=self.channelwise)
                        out = None
                    if new_weight is not None:
                        self.weight = new_weight
                    self._quantized = True
                    if out is None:
                        out = self.callback(x, self.bits, self.weight,
                                            channel_index=self.channelwise)
                elif self._quantized:
                    out = self.callback(x, self.bits, self.weight,
                                        channel_index=self.channelwise)
                else:
                    out = x
            else:
                out = x
            if self.training:
                self._n_updates = t + 1
        else:
            out = x
        return out

    __call__ = forward


# ----------------------------------- main ------------------------------------ #

if __name__ == "__main__":
    def ref_quant(x, ca, bits=8):
        qmax = float(2 ** (bits - 1) - 1)
        axes = tuple(i for i in range(x.ndim) if i != ca)
        maxabs = jnp.max(jnp.abs(x), axis=axes)
        scale = jnp.where(maxabs > 0, maxabs / qmax, 1.0)
        shp = [1] * x.ndim
        shp[ca] = x.shape[ca]
        sc = scale.reshape(shp)
        inv = 1.0 / sc                       # same reciprocal formulation as the kernel
        q = jnp.clip(jnp.round(x * inv), -(qmax + 1.0), qmax)
        return q * sc, scale

    key = jax.random.PRNGKey(0)
    x = jax.random.normal(key, (2, 4, 16, 16), dtype=jnp.float32)   # NCHW, channelwise=1

    # --- layer lifecycle: pass-through before timeout, fused quantize at/after ---
    layer = QuantizeLayer(bits=8, channelwise=1, timeout=2)
    y0 = layer(x)
    y1 = layer(x)
    y2 = layer(x)                            # t == timeout -> fused single-pass kernel
    jax.block_until_ready(y2)
    ref_y, ref_s = ref_quant(x, 1)
    assert jnp.array_equal(y0, x) and jnp.array_equal(y1, x)
    assert jnp.allclose(y2, ref_y, atol=1e-6), "training (fused) kernel mismatch"
    assert jnp.allclose(layer.weight[:, 0], ref_s), "scale (weight) mismatch"

    # --- eval path: quantize with the stored weight (standalone quantize kernel) ---
    layer.training = False
    y3 = layer(x)
    jax.block_until_ready(y3)
    assert jnp.allclose(y3, ref_y, atol=1e-6), "eval quantize kernel mismatch"

    # --- standalone optimize (abs-max -> scale kernel) ---
    w = layer.callback.optimize(x, 8, None, channel_index=1)
    assert jnp.allclose(w[:, 0], ref_s), "optimize kernel mismatch"

    # --- large-tensor (two-phase) path, including a ragged lane tile (b=100) ---
    x3 = jax.random.normal(jax.random.PRNGKey(1), (2, 8, 10, 10), dtype=jnp.float32)
    y_tp, w_tp = _train_quantize(x3, 8, 1, force_two_phase=True)
    jax.block_until_ready(y_tp)
    r_y, r_s = ref_quant(x3, 1)
    assert jnp.allclose(y_tp, r_y, atol=1e-6), "two-phase kernel mismatch"
    assert jnp.allclose(w_tp[:, 0], r_s), "two-phase scale mismatch"
    y_tp2 = _apply_quantize(x3, w_tp, 8, 1)  # ragged-lane standalone quantize
    assert jnp.allclose(y_tp2, r_y, atol=1e-6), "ragged quantize mismatch"

    # --- channel-axis-last fast path (lane-major layout) ---
    xl = jax.random.normal(jax.random.PRNGKey(2), (2, 8, 32), dtype=jnp.float32)
    yl, wl = _train_quantize(xl, 8, 2)
    jax.block_until_ready(yl)
    rl_y, rl_s = ref_quant(xl, 2)
    assert jnp.allclose(yl, rl_y, atol=1e-6), "channel-last fused kernel mismatch"
    assert jnp.allclose(wl[:, 0], rl_s), "channel-last scale mismatch"
    yl2 = _apply_quantize(xl, wl, 8, 2)
    assert jnp.allclose(yl2, rl_y, atol=1e-6), "channel-last quantize mismatch"
    wl2 = _channel_scale(xl, 8, 2)
    assert jnp.allclose(wl2[:, 0], rl_s), "channel-last optimize mismatch"

    print("KERNEL_OK")
</pallas_src>

<mosaic_0001>
module attributes {stable_mosaic.version = 11 : i64} {
  func.func @_fused_small_kernel(%arg0: i32, %arg1: memref<2x4x256xf32, #tpu.memory_space<vmem>>, %arg2: memref<2x4x256xf32, #tpu.memory_space<vmem>>, %arg3: memref<4x1xf32, #tpu.memory_space<vmem>>) attributes {dimension_semantics = [#tpu.dimension_semantics<parallel>], iteration_bounds = array<i64: 1>, scalar_prefetch = 0 : i64, scratch_operands = 0 : i64, tpu.core_type = #tpu.core_type<tc>, window_params = [{transform_indices = @transform_0, window_bounds = array<i64: 2, 4, 256>}, {transform_indices = @transform_1, window_bounds = array<i64: 2, 4, 256>}, {transform_indices = @transform_2, window_bounds = array<i64: 4, 1>}]} {
    %c0 = arith.constant 0 : index
    %c0_0 = arith.constant 0 : index
    %c0_1 = arith.constant 0 : index
    %0 = vector.load %arg1[%c0, %c0_0, %c0_1] : memref<2x4x256xf32, #tpu.memory_space<vmem>>, vector<2x4x256xf32>
    %1 = math.absf %0 : vector<2x4x256xf32>
    %cst = arith.constant dense<0xFF800000> : vector<2x4xf32>
    %2 = vector.multi_reduction <maximumf>, %1, %cst [2] : vector<2x4x256xf32> to vector<2x4xf32>
    %3 = vector.shape_cast %2 : vector<2x4xf32> to vector<2x4x1xf32>
    %cst_2 = arith.constant dense<0xFF800000> : vector<4x1xf32>
    %4 = vector.multi_reduction <maximumf>, %3, %cst_2 [0] : vector<2x4x1xf32> to vector<4x1xf32>
    %cst_3 = arith.constant 0.000000e+00 : f32
    %5 = vector.broadcast %cst_3 : f32 to vector<4x1xf32>
    %6 = arith.cmpf ogt, %4, %5 : vector<4x1xf32>
    %cst_4 = arith.constant 1.270000e+02 : f32
    %7 = vector.broadcast %cst_4 : f32 to vector<4x1xf32>
    %8 = arith.divf %4, %7 : vector<4x1xf32>
    %cst_5 = arith.constant 1.000000e+00 : f32
    %9 = vector.broadcast %cst_5 : f32 to vector<4x1xf32>
    %10 = arith.select %6, %8, %9 : vector<4x1xi1>, vector<4x1xf32>
    %c0_6 = arith.constant 0 : index
    %c0_7 = arith.constant 0 : index
    %11 = vector.load %arg3[%c0_6, %c0_7] : memref<4x1xf32, #tpu.memory_space<vmem>>, vector<4x1xf32>
    tpu.vector_store %arg3[%c0_6, %c0_7], %10 {strides = array<i32>} : memref<4x1xf32, #tpu.memory_space<vmem>>, vector<4x1xf32>,
    %cst_8 = arith.constant 1.000000e+00 : f32
    %12 = vector.broadcast %cst_8 : f32 to vector<4x1xf32>
    %13 = arith.divf %12, %10 : vector<4x1xf32>
    %14 = vector.shape_cast %13 : vector<4x1xf32> to vector<1x4x1xf32>
    %15 = vector.broadcast %14 : vector<1x4x1xf32> to vector<2x4x256xf32>
    %16 = arith.mulf %0, %15 : vector<2x4x256xf32>
    %17 = math.roundeven %16 : vector<2x4x256xf32>
    %cst_9 = arith.constant -1.280000e+02 : f32
    %cst_10 = arith.constant 1.270000e+02 : f32
    %18 = vector.broadcast %cst_9 : f32 to vector<2x4x256xf32>
    %19 = arith.maximumf %18, %17 : vector<2x4x256xf32>
    %20 = vector.broadcast %cst_10 : f32 to vector<2x4x256xf32>
    %21 = arith.minimumf %20, %19 : vector<2x4x256xf32>
    %22 = vector.shape_cast %10 : vector<4x1xf32> to vector<1x4x1xf32>
    %23 = vector.broadcast %22 : vector<1x4x1xf32> to vector<2x4x256xf32>
    %24 = arith.mulf %21, %23 : vector<2x4x256xf32>
    %c0_11 = arith.constant 0 : index
    %c0_12 = arith.constant 0 : index
    %c0_13 = arith.constant 0 : index
    %25 = vector.load %arg2[%c0_11, %c0_12, %c0_13] : memref<2x4x256xf32, #tpu.memory_space<vmem>>, vector<2x4x256xf32>
    tpu.vector_store %arg2[%c0_11, %c0_12, %c0_13], %24 {strides = array<i32>} : memref<2x4x256xf32, #tpu.memory_space<vmem>>, vector<2x4x256xf32>,
    return
  }
  func.func @transform_0(%arg0: i32) -> (i32, i32, i32) {
    %c0_i32 = arith.constant 0 : i32
    %c0_i32_0 = arith.constant 0 : i32
    %c0_i32_1 = arith.constant 0 : i32
    return %c0_i32, %arg0, %c0_i32_0 : i32, i32, i32
  }
  func.func @transform_1(%arg0: i32) -> (i32, i32, i32) {
    %c0_i32 = arith.constant 0 : i32
    %c0_i32_0 = arith.constant 0 : i32
    %c0_i32_1 = arith.constant 0 : i32
    return %c0_i32, %arg0, %c0_i32_0 : i32, i32, i32
  }
  func.func @transform_2(%arg0: i32) -> (i32, i32) {
    %c0_i32 = arith.constant 0 : i32
    %c0_i32_0 = arith.constant 0 : i32
    return %arg0, %c0_i32 : i32, i32
  }
}

</mosaic_0001>

<bundles_post_ra>
// kernel: tpu_custom_call.1
= control target key start
LH: loop header
LB: loop body
LE: loop exit
PB: predicated region body
PF: predicated region fallthrough
CT: control target
= control target key end

     0   :  { %8 = vsyncpa [#allocation3], 0  ;;  %s252_s0 = inlined_call_operand.hbm [shape: f32[2,4,256], index: 0, kind: input, shape index: {}]   ;;  %s253_s1 = inlined_call_operand.hbm [shape: f32[2,4,256], index: 1, kind: output, shape index: {0}]   ;;  %s254_s2 = inlined_call_operand.vmem [shape: f32[4,1], index: 2, kind: output, shape index: {1}]  }
   0x1   :  { %9 = vsyncpa [#allocation4], 0  ;;  %s14_s11 = sshll.u32 %s252_s0, 4  ;;  %s210_s12 = smov [#allocation2]   ;;  %s15_s11 = int_to_ptr.hbm [resolvable:$true] %s14_s11 }
   0x2   :  { %s16_s13 = sshll.u32 %s210_s12, 4  ;;  %s211_s14 = smov 128   ;;  %s17_s13 = int_to_ptr.vmem [resolvable:$true] %s16_s13 }
   0x3   :  { %s212_s15 = smov 8  }
   0x4   :  { %22 = dma.hbm_to_vmem [thread:$0]  %s15_s11, 256, %s17_s13, [#allocation3], %s211_s14, %s211_s14, %s212_s15  }
   0x5   :  { %206 = dma.done.wait [#allocation3], 256  }
   0x6   :  { %207 = vsyncadd [#allocation3], 4294967040  ;;  %v27_v0 = vld [vmem:[#allocation2] sm:$0xff]  ;;  %v28_v1 = vld [vmem:[#allocation2 + $0x8] sm:$0xff]  ;;  %vm44_vm0 = vcmask 1043456   ;;  %v213_v14 = vmov 127.0  }
   0x7   :  { %v29_v2 = vand.u32 2147483647, %v27_v0  ;;  %v30_v3 = vand.u32 2147483647, %v28_v1  ;;  %154 = vrcp.f32 %v213_v14  ;;  %vm68_vm2 = vcmask 3072   ;;  %s115_s20 = sshll.u32 %s253_s1, 4  ;;  %s116_s20 = int_to_ptr.hbm [resolvable:$true] %s115_s20 }
   0x8   :  { %v214_v34 = vmov 839922192  }
   0x9   :  { %33 = vst [vmem:[#allocation1] ss:$2 sm:$0xff] %v29_v2  ;;  %v87_v35 = vunpack.c.l.s4 %v214_v34 }
   0xa   :  { %37 = vst [vmem:[#allocation1 + $0x10] ss:$2 sm:$0xff] %v30_v3 }
   0xb   :  { %v88_v39 = vunpack.c.0.s8 %v87_v35 }
   0xd   :  { %v155_v15 = vpop.eup %154 }
   0xe   :  { %v60_v16 = vmul.f32 127.0, %v155_v15  ;;  %vm64_vm1 = vweird.f32 %v155_v15 }
  0x10   :  { %v34_v4 = vld.sshfl [vmem:[#allocation1] sm:$0xff pattern:$0x75316420]  ;;  %v35_v5 = vld.sshfl [vmem:[#allocation1 + $0x8] sm:$0xff pattern:$0x75316420] }
  0x11   :  { %v45_v6 = vsel %vm44_vm0, %v34_v4, -inf  ;;  %v46_v7 = vsel %vm44_vm0, %v35_v5, -inf  ;;  %v38_v9 = vld.sshfl [vmem:[#allocation1 + $0x10] sm:$0xff pattern:$0x75316420]  ;;  %v61_v17 = vsub.f32 1.0, %v60_v16 }
  0x12   :  { %v47_v8 = vmax.f32 %v45_v6, %v46_v7  ;;  %v39_v10 = vld.sshfl [vmem:[#allocation1 + $0x18] sm:$0xff pattern:$0x75316420]  ;;  %v50_v11 = vsel %vm44_vm0, %v38_v9, -inf }
  0x13   :  { %v51_v12 = vsel %vm44_vm0, %v39_v10, -inf  ;;  %v62_v19 = vmul.f32 %v155_v15, %v61_v17 }
  0x14   :  { %48 = vmax.xlane.f32.xlu0 %v47_v8  ;;  %v52_v13 = vmax.f32 %v50_v11, %v51_v12 }
  0x15   :  { %v63_v20 = vadd.f32 %v155_v15, %v62_v19 }
  0x17   :  { %v65_v23 = vsel %vm64_vm1, %v155_v15, %v63_v20 }
  0x1c   :  { %53 = vmax.xlane.f32.xlu0 %v52_v13 }
  0x87   :  { %v49_v18 = vpop.xlane.xlu0 %48 }
  0x88   :  { %v55_v22 = vsel %vm44_vm0, %v49_v18, -inf }
  0x8f   :  { %v54_v21 = vpop.xlane.xlu0 %53 }
  0x90   :  { %v56_v24 = vsel %vm44_vm0, %v54_v21, -inf }
  0x91   :  { %v57_v25 = vmax.f32 %v55_v22, %v56_v24 }
  0x93   :  { %vm58_vm3 = vcmp.gt.f32.partialorder %v57_v25, 0.0  ;;  %v66_v26 = vmul.f32 %v65_v23, %v57_v25 }
  0x95   :  { %v67_v27 = vsel %vm58_vm3, %v66_v26, 1.0 }
  0x96   :  { %69 = vst.msk [vmem:[%s254_s2] sm:$0xf] %vm68_vm2, %v67_v27  ;;  %156 = vrcp.f32 %v67_v27  ;;  %v81_v31 = vand.u32 2147483648, %v67_v27  ;;  %v79_v33 = vand.u32 2147483647, %v67_v27  ;;  %vm75_vm5 = vweird.f32 %v67_v27  ;;  %s215_s2 = smov [#allocation5]  }
  0x97   :  { %v103_v61 = vperm.slane %v67_v27, %v88_v39  ;;  %s113_s17 = sshll.u32 %s215_s2, 4  ;;  %s114_s17 = int_to_ptr.vmem [resolvable:$true] %s113_s17 }
  0x98   :  { %v82_v37 = vor.u32 1.1754944e-38, %v81_v31  ;;  %vm80_vm7 = vcmp.eq.f32.partialorder %v79_v33, 8.507059e+37 }
  0x9c   :  { %v157_v28 = vpop.eup %156 }
  0x9d   :  { %v71_v29 = vmul.f32 %v157_v28, %v67_v27  ;;  %vm76_vm4 = vweird.f32 %v157_v28 }
  0x9e   :  { %vm77_vm6 = vmor %vm75_vm5, %vm76_vm4 }
  0x9f   :  { %v72_v30 = vsub.f32 1.0, %v71_v29 }
  0xa1   :  { %v73_v32 = vmul.f32 %v157_v28, %v72_v30 }
  0xa3   :  { %v74_v36 = vadd.f32 %v157_v28, %v73_v32 }
  0xa5   :  { %v78_v38 = vsel %vm77_vm6, %v157_v28, %v74_v36 }
  0xa6   :  { %v83_v40 = vsel %vm80_vm7, %v82_v37, %v78_v38 }
  0xa7   :  { %v89_v41 = vperm.slane %v83_v40, %v88_v39 }
  0xa9   :  { %v91_v42 = vmul.f32 %v89_v41, %v27_v0  ;;  %v92_v43 = vmul.f32 %v89_v41, %v28_v1 }
  0xab   :  { %v134_v44 = vcvt.f32.s32 %v91_v42  ;;  %v142_v45 = vcvt.f32.s32 %v92_v43  ;;  %v132_v47 = vand.u32 2147483647, %v91_v42  ;;  %v137_v50 = vand.u32 2147483648, %v91_v42 }
  0xac   :  { %v140_v51 = vand.u32 2147483647, %v92_v43  ;;  %v145_v53 = vand.u32 2147483648, %v92_v43 }
  0xad   :  { %v135_v46 = vcvt.s32.f32 %v134_v44  ;;  %v143_v48 = vcvt.s32.f32 %v142_v45  ;;  %vm133_vm8 = vcmp.lt.f32.partialorder %v132_v47, 8388608.0 }
  0xae   :  { %vm141_vm9 = vcmp.lt.f32.partialorder %v140_v51, 8388608.0 }
  0xaf   :  { %v136_v49 = vand.u32 2147483647, %v135_v46  ;;  %v144_v52 = vand.u32 2147483647, %v143_v48 }
  0xb1   :  { %v138_v54 = vor.u32 %v137_v50, %v136_v49  ;;  %v146_v55 = vor.u32 %v145_v53, %v144_v52 }
  0xb3   :  { %v139_v56 = vsel %vm133_vm8, %v138_v54, %v91_v42  ;;  %v147_v57 = vsel %vm141_vm9, %v146_v55, %v92_v43 }
  0xb4   :  { %v95_v58 = vmax.f32 %v139_v56, -128.0  ;;  %v96_v59 = vmax.f32 %v147_v57, -128.0 }
  0xb6   :  { %v97_v60 = vmin.f32 %v95_v58, 127.0  ;;  %v98_v62 = vmin.f32 %v96_v59, 127.0 }
  0xb8   :  { %v105_v63 = vmul.f32 %v103_v61, %v97_v60  ;;  %v106_v0 = vmul.f32 %v103_v61, %v98_v62 }
  0xba   :  { %107 = vst [vmem:[#allocation5] sm:$0xff] %v105_v63 }
  0xbb   :  { %108 = vst [vmem:[#allocation5 + $0x8] sm:$0xff] %v106_v0 }
  0xbc   :  { %121 = dma.vmem_to_hbm [thread:$0]  %s114_s17, 256, %s116_s20, [#allocation4], %s211_s14, %s211_s14, %s212_s15  }
  0xbd   :  { %208 = dma.done.wait [#allocation4], 256  }
  0xbe   :  { %209 = vsyncadd [#allocation4], 4294967040 }
  0xbf   :  { %130 = vsyncpa [#allocation3], 1 }
  0xc0   :  { %131 = vsyncpa [#allocation4], 1 }

</bundles_post_ra>
